<compile_context>
chip_gen: v7x
topology: tpu7x:2x2x1
jax: 0.10.0
libtpu: 0.0.40
codegen_flags: <defaults>
</compile_context>

<pallas_src>
import functools

import jax
import jax.numpy as jnp
from jax import lax
from jax.experimental import pallas as pl
from jax.experimental.pallas import tpu as pltpu
import numpy as np


def _cnn_branch_kernel(x_ref, masks_ref, dww_ref, wbd_ref, bbd_ref, out_ref,
                       *, H, W):
    # x_ref:     (R, S) VMEM, R = Nb*C (batch fused into sublanes), S = D*H*W
    # masks_ref: (27, S) VMEM  -- precomputed f32 boundary masks per tap
    # dww_ref:   (R, 27) VMEM  -- depthwise taps, row = n*C + c, col k = kd*9+kh*3+kw
    # wbd_ref:   (R, R) VMEM   -- block-diagonal BN-folded pointwise weight
    # bbd_ref:   (R, 1) VMEM   -- fused bias (dw bias + pw bias + BN), tiled per batch
    # out_ref:   (R, S) VMEM
    S = x_ref.shape[1]
    x = x_ref[...]                                     # (R, S) f32

    # Depthwise 3x3x3 conv (groups=C): start from the center tap (offset 0,
    # mask is all-ones), then 26 taps = XLU roll + mask mul + per-row FMA (VPU).
    acc = dww_ref[:, pl.ds(13, 1)] * x                 # center tap (kd=kh=kw=1)
    for kd in range(3):
        for kh in range(3):
            for kw in range(3):
                k = kd * 9 + kh * 3 + kw
                if k == 13:
                    continue
                off = (kd - 1) * H * W + (kh - 1) * W + (kw - 1)
                shifted = pltpu.roll(x, shift=(-off) % S, axis=1)
                mask = masks_ref[pl.ds(k, 1), :]       # (1, S) f32
                acc = acc + dww_ref[:, pl.ds(k, 1)] * (mask * shifted)

    # Fused pointwise conv + BatchNorm (+ all biases) as one MXU matmul over
    # the block-diagonal weight (rows stay batch-separated), ReLU6, residual.
    y = jnp.dot(wbd_ref[...], acc, preferred_element_type=jnp.float32) + bbd_ref[...]
    out_ref[...] = (x + jnp.clip(y, 0.0, 6.0)).astype(out_ref.dtype)


def cnn_branch_forward(x_ncdhw, dw_w, dw_b, pw_w, pw_b,
                       gamma, beta, running_mean, running_var, eps=1e-5):
    """x_ncdhw: (N, C, D, H, W) float32. Returns (N, C, D, H, W)."""
    N, C, D, H, W = x_ncdhw.shape
    S = D * H * W

    # Fuse enough batch elements per grid step to fill the 8 f32 sublanes
    # (largest divisor of N that is <= ceil(8 / C)).
    target = max(1, -(-8 // C))
    Nb = 1
    for d in range(1, N + 1):
        if N % d == 0 and d <= target:
            Nb = d
    R = Nb * C
    G = N // Nb

    # Lane-dense, sublane-dense view; pure metadata reshape, no transposes.
    x_flat = x_ncdhw.astype(jnp.float32).reshape(N * C, S)

    # Fold BatchNorm (inference) and both conv biases into one matmul weight/bias.
    bns = gamma / jnp.sqrt(running_var + eps)
    bnb = beta - running_mean * bns
    pw2d = pw_w.reshape(C, C).astype(jnp.float32)
    w_f = bns[:, None] * pw2d                                        # (C, C)
    b_f = bns * (pw2d @ dw_b.astype(jnp.float32) + pw_b) + bnb       # (C,)

    # Block-diagonal weight / tiled bias so one matmul covers all Nb fused batches.
    w_bd = jnp.kron(jnp.eye(Nb, dtype=jnp.float32), w_f)             # (R, R)
    b_bd = jnp.tile(b_f, (Nb,)).reshape(R, 1).astype(jnp.float32)    # (R, 1)

    # Depthwise taps as one contiguous (R, 27) tile, row order matches x_flat.
    dww = jnp.tile(dw_w.reshape(C, 27).astype(jnp.float32), (Nb, 1))

    # Precompute the 27 boundary masks host-side; constant index_map -> Pallas
    # DMAs them once (block index never changes).
    pos = jnp.arange(S, dtype=jnp.int32)
    d_idx = pos // (H * W)
    h_idx = (pos // W) % H
    w_idx = pos % W
    masks = []
    for kd in range(3):
        for kh in range(3):
            for kw in range(3):
                od, oh, ow = kd - 1, kh - 1, kw - 1
                m = ((d_idx + od >= 0) & (d_idx + od < D) &
                     (h_idx + oh >= 0) & (h_idx + oh < H) &
                     (w_idx + ow >= 0) & (w_idx + ow < W))
                masks.append(m.astype(jnp.float32))
    masks = jnp.stack(masks)                                         # (27, S)

    flops = int(N * C * S * (2 * 27 + 2 * R + 4))
    bytes_accessed = int(4 * (2 * N * C * S + 27 * S + R * 27 + R * R + R))

    out = pl.pallas_call(
        functools.partial(_cnn_branch_kernel, H=H, W=W),
        out_shape=jax.ShapeDtypeStruct((N * C, S), jnp.float32),
        grid=(G,),
        in_specs=[
            pl.BlockSpec((R, S), lambda g: (g, 0)),      # x (input + residual)
            pl.BlockSpec((27, S), lambda g: (0, 0)),     # boundary masks
            pl.BlockSpec((R, 27), lambda g: (0, 0)),     # depthwise taps
            pl.BlockSpec((R, R), lambda g: (0, 0)),      # block-diag pointwise*BN
            pl.BlockSpec((R, 1), lambda g: (0, 0)),      # fused bias
        ],
        out_specs=pl.BlockSpec((R, S), lambda g: (g, 0)),
        input_output_aliases={0: 0},                     # in-place out = x + f(x)
        compiler_params=pltpu.CompilerParams(
            dimension_semantics=("parallel",)),
        cost_estimate=pl.CostEstimate(flops=flops, transcendentals=0,
                                      bytes_accessed=bytes_accessed),
    )(x_flat, masks, dww, w_bd, b_bd)

    return out.reshape(N, C, D, H, W)


def cnn_branch_reference(x, dw_w, dw_b, pw_w, pw_b,
                         gamma, beta, running_mean, running_var, eps=1e-5):
    """Pure-JAX reference (same math as the PyTorch module, BN in eval mode)."""
    N, C, D, H, W = x.shape
    dn = lax.conv_dimension_numbers(x.shape, dw_w.shape, ('NCDHW', 'OIDHW', 'NCDHW'))
    y = lax.conv_general_dilated(x, dw_w, (1, 1, 1),
                                 ((1, 1), (1, 1), (1, 1)),
                                 dimension_numbers=dn, feature_group_count=C)
    y = y + dw_b.reshape(1, C, 1, 1, 1)
    dn2 = lax.conv_dimension_numbers(y.shape, pw_w.shape, ('NCDHW', 'OIDHW', 'NCDHW'))
    y = lax.conv_general_dilated(y, pw_w, (1, 1, 1), 'VALID', dimension_numbers=dn2)
    y = y + pw_b.reshape(1, C, 1, 1, 1)
    scale = gamma / jnp.sqrt(running_var + eps)
    y = (y - running_mean.reshape(1, C, 1, 1, 1)) * scale.reshape(1, C, 1, 1, 1) \
        + beta.reshape(1, C, 1, 1, 1)
    y = jnp.clip(y, 0.0, 6.0)
    return x + y


if __name__ == "__main__":
    key = jax.random.PRNGKey(0)
    N, C, D, H, W = 2, 4, 4, 8, 8   # D*H*W = 256 lanes, N*C = 8 sublanes

    k = jax.random.split(key, 8)
    x = jax.random.normal(k[0], (N, C, D, H, W), jnp.float32)

    # Conv3d(C, C, k=3, pad=1, groups=C): weight (C, 1, 3, 3, 3), bias (C,)
    dw_w = 0.2 * jax.random.normal(k[1], (C, 1, 3, 3, 3), jnp.float32)
    dw_b = 0.1 * jax.random.normal(k[2], (C,), jnp.float32)
    # Conv3d(C, C, k=1): weight (C, C, 1, 1, 1), bias (C,)
    pw_w = 0.3 * jax.random.normal(k[3], (C, C, 1, 1, 1), jnp.float32)
    pw_b = 0.1 * jax.random.normal(k[4], (C,), jnp.float32)
    # BatchNorm3d(C) parameters / running stats (inference mode)
    gamma = 1.0 + 0.1 * jax.random.normal(k[5], (C,), jnp.float32)
    beta = 0.1 * jax.random.normal(k[6], (C,), jnp.float32)
    running_mean = 0.1 * jax.random.normal(k[7], (C,), jnp.float32)
    running_var = jnp.ones((C,), jnp.float32)

    out = cnn_branch_forward(x, dw_w, dw_b, pw_w, pw_b,
                             gamma, beta, running_mean, running_var)
    out = jax.block_until_ready(out)

    ref = cnn_branch_reference(x, dw_w, dw_b, pw_w, pw_b,
                               gamma, beta, running_mean, running_var)
    np.testing.assert_allclose(np.asarray(out), np.asarray(ref),
                               rtol=2e-4, atol=2e-4)
    print("KERNEL_OK")
</pallas_src>

<mosaic_0001>
module attributes {stable_mosaic.version = 11 : i64} {
  func.func @_cnn_branch_kernel(%arg0: i32, %arg1: memref<8x256xf32, #tpu.memory_space<vmem>>, %arg2: memref<27x256xf32, #tpu.memory_space<vmem>>, %arg3: memref<8x27xf32, #tpu.memory_space<vmem>>, %arg4: memref<8x8xf32, #tpu.memory_space<vmem>>, %arg5: memref<8x1xf32, #tpu.memory_space<vmem>>, %arg6: memref<8x256xf32, #tpu.memory_space<vmem>>) attributes {dimension_semantics = [#tpu.dimension_semantics<parallel>], iteration_bounds = array<i64: 1>, scalar_prefetch = 0 : i64, scratch_operands = 0 : i64, tpu.core_type = #tpu.core_type<tc>, window_params = [{transform_indices = @transform_0, window_bounds = array<i64: 8, 256>}, {pipeline_mode = #tpu.pipeline_mode<synchronous>, transform_indices = @transform_1, window_bounds = array<i64: 27, 256>}, {pipeline_mode = #tpu.pipeline_mode<synchronous>, transform_indices = @transform_2, window_bounds = array<i64: 8, 27>}, {pipeline_mode = #tpu.pipeline_mode<synchronous>, transform_indices = @transform_3, window_bounds = array<i64: 8, 8>}, {pipeline_mode = #tpu.pipeline_mode<synchronous>, transform_indices = @transform_4, window_bounds = array<i64: 8, 1>}, {transform_indices = @transform_5, window_bounds = array<i64: 8, 256>}]} {
    %c0 = arith.constant 0 : index
    %c0_0 = arith.constant 0 : index
    %0 = vector.load %arg1[%c0, %c0_0] : memref<8x256xf32, #tpu.memory_space<vmem>>, vector<8x256xf32>
    %c0_1 = arith.constant 0 : index
    %c13 = arith.constant 13 : index
    %1 = vector.load %arg3[%c0_1, %c13] : memref<8x27xf32, #tpu.memory_space<vmem>>, vector<8x1xf32>
    %2 = vector.broadcast %1 : vector<8x1xf32> to vector<8x256xf32>
    %3 = arith.mulf %2, %0 : vector<8x256xf32>
    %c73_i32 = arith.constant 73 : i32
    %4 = tpu.dynamic_rotate %0 by %c73_i32 dim 1 : vector<8x256xf32>, i32 -> vector<8x256xf32>
    %c0_2 = arith.constant 0 : index
    %c0_3 = arith.constant 0 : index
    %5 = vector.load %arg2[%c0_2, %c0_3] : memref<27x256xf32, #tpu.memory_space<vmem>>, vector<1x256xf32>
    %c0_4 = arith.constant 0 : index
    %c0_5 = arith.constant 0 : index
    %6 = vector.load %arg3[%c0_4, %c0_5] : memref<8x27xf32, #tpu.memory_space<vmem>>, vector<8x1xf32>
    %7 = vector.broadcast %5 : vector<1x256xf32> to vector<8x256xf32>
    %8 = arith.mulf %7, %4 : vector<8x256xf32>
    %9 = vector.broadcast %6 : vector<8x1xf32> to vector<8x256xf32>
    %10 = arith.mulf %9, %8 : vector<8x256xf32>
    %11 = arith.addf %3, %10 : vector<8x256xf32>
    %c72_i32 = arith.constant 72 : i32
    %12 = tpu.dynamic_rotate %0 by %c72_i32 dim 1 : vector<8x256xf32>, i32 -> vector<8x256xf32>
    %c1 = arith.constant 1 : index
    %c0_6 = arith.constant 0 : index
    %13 = vector.load %arg2[%c1, %c0_6] : memref<27x256xf32, #tpu.memory_space<vmem>>, vector<1x256xf32>
    %c0_7 = arith.constant 0 : index
    %c1_8 = arith.constant 1 : index
    %14 = vector.load %arg3[%c0_7, %c1_8] : memref<8x27xf32, #tpu.memory_space<vmem>>, vector<8x1xf32>
    %15 = vector.broadcast %13 : vector<1x256xf32> to vector<8x256xf32>
    %16 = arith.mulf %15, %12 : vector<8x256xf32>
    %17 = vector.broadcast %14 : vector<8x1xf32> to vector<8x256xf32>
    %18 = arith.mulf %17, %16 : vector<8x256xf32>
    %19 = arith.addf %11, %18 : vector<8x256xf32>
    %c71_i32 = arith.constant 71 : i32
    %20 = tpu.dynamic_rotate %0 by %c71_i32 dim 1 : vector<8x256xf32>, i32 -> vector<8x256xf32>
    %c2 = arith.constant 2 : index
    %c0_9 = arith.constant 0 : index
    %21 = vector.load %arg2[%c2, %c0_9] : memref<27x256xf32, #tpu.memory_space<vmem>>, vector<1x256xf32>
    %c0_10 = arith.constant 0 : index
    %c2_11 = arith.constant 2 : index
    %22 = vector.load %arg3[%c0_10, %c2_11] : memref<8x27xf32, #tpu.memory_space<vmem>>, vector<8x1xf32>
    %23 = vector.broadcast %21 : vector<1x256xf32> to vector<8x256xf32>
    %24 = arith.mulf %23, %20 : vector<8x256xf32>
    %25 = vector.broadcast %22 : vector<8x1xf32> to vector<8x256xf32>
    %26 = arith.mulf %25, %24 : vector<8x256xf32>
    %27 = arith.addf %19, %26 : vector<8x256xf32>
    %c65_i32 = arith.constant 65 : i32
    %28 = tpu.dynamic_rotate %0 by %c65_i32 dim 1 : vector<8x256xf32>, i32 -> vector<8x256xf32>
    %c3 = arith.constant 3 : index
    %c0_12 = arith.constant 0 : index
    %29 = vector.load %arg2[%c3, %c0_12] : memref<27x256xf32, #tpu.memory_space<vmem>>, vector<1x256xf32>
    %c0_13 = arith.constant 0 : index
    %c3_14 = arith.constant 3 : index
    %30 = vector.load %arg3[%c0_13, %c3_14] : memref<8x27xf32, #tpu.memory_space<vmem>>, vector<8x1xf32>
    %31 = vector.broadcast %29 : vector<1x256xf32> to vector<8x256xf32>
    %32 = arith.mulf %31, %28 : vector<8x256xf32>
    %33 = vector.broadcast %30 : vector<8x1xf32> to vector<8x256xf32>
    %34 = arith.mulf %33, %32 : vector<8x256xf32>
    %35 = arith.addf %27, %34 : vector<8x256xf32>
    %c64_i32 = arith.constant 64 : i32
    %36 = tpu.dynamic_rotate %0 by %c64_i32 dim 1 : vector<8x256xf32>, i32 -> vector<8x256xf32>
    %c4 = arith.constant 4 : index
    %c0_15 = arith.constant 0 : index
    %37 = vector.load %arg2[%c4, %c0_15] : memref<27x256xf32, #tpu.memory_space<vmem>>, vector<1x256xf32>
    %c0_16 = arith.constant 0 : index
    %c4_17 = arith.constant 4 : index
    %38 = vector.load %arg3[%c0_16, %c4_17] : memref<8x27xf32, #tpu.memory_space<vmem>>, vector<8x1xf32>
    %39 = vector.broadcast %37 : vector<1x256xf32> to vector<8x256xf32>
    %40 = arith.mulf %39, %36 : vector<8x256xf32>
    %41 = vector.broadcast %38 : vector<8x1xf32> to vector<8x256xf32>
    %42 = arith.mulf %41, %40 : vector<8x256xf32>
    %43 = arith.addf %35, %42 : vector<8x256xf32>
    %c63_i32 = arith.constant 63 : i32
    %44 = tpu.dynamic_rotate %0 by %c63_i32 dim 1 : vector<8x256xf32>, i32 -> vector<8x256xf32>
    %c5 = arith.constant 5 : index
    %c0_18 = arith.constant 0 : index
    %45 = vector.load %arg2[%c5, %c0_18] : memref<27x256xf32, #tpu.memory_space<vmem>>, vector<1x256xf32>
    %c0_19 = arith.constant 0 : index
    %c5_20 = arith.constant 5 : index
    %46 = vector.load %arg3[%c0_19, %c5_20] : memref<8x27xf32, #tpu.memory_space<vmem>>, vector<8x1xf32>
    %47 = vector.broadcast %45 : vector<1x256xf32> to vector<8x256xf32>
    %48 = arith.mulf %47, %44 : vector<8x256xf32>
    %49 = vector.broadcast %46 : vector<8x1xf32> to vector<8x256xf32>
    %50 = arith.mulf %49, %48 : vector<8x256xf32>
    %51 = arith.addf %43, %50 : vector<8x256xf32>
    %c57_i32 = arith.constant 57 : i32
    %52 = tpu.dynamic_rotate %0 by %c57_i32 dim 1 : vector<8x256xf32>, i32 -> vector<8x256xf32>
    %c6 = arith.constant 6 : index
    %c0_21 = arith.constant 0 : index
    %53 = vector.load %arg2[%c6, %c0_21] : memref<27x256xf32, #tpu.memory_space<vmem>>, vector<1x256xf32>
    %c0_22 = arith.constant 0 : index
    %c6_23 = arith.constant 6 : index
    %54 = vector.load %arg3[%c0_22, %c6_23] : memref<8x27xf32, #tpu.memory_space<vmem>>, vector<8x1xf32>
    %55 = vector.broadcast %53 : vector<1x256xf32> to vector<8x256xf32>
    %56 = arith.mulf %55, %52 : vector<8x256xf32>
    %57 = vector.broadcast %54 : vector<8x1xf32> to vector<8x256xf32>
    %58 = arith.mulf %57, %56 : vector<8x256xf32>
    %59 = arith.addf %51, %58 : vector<8x256xf32>
    %c56_i32 = arith.constant 56 : i32
    %60 = tpu.dynamic_rotate %0 by %c56_i32 dim 1 : vector<8x256xf32>, i32 -> vector<8x256xf32>
    %c7 = arith.constant 7 : index
    %c0_24 = arith.constant 0 : index
    %61 = vector.load %arg2[%c7, %c0_24] : memref<27x256xf32, #tpu.memory_space<vmem>>, vector<1x256xf32>
    %c0_25 = arith.constant 0 : index
    %c7_26 = arith.constant 7 : index
    %62 = vector.load %arg3[%c0_25, %c7_26] : memref<8x27xf32, #tpu.memory_space<vmem>>, vector<8x1xf32>
    %63 = vector.broadcast %61 : vector<1x256xf32> to vector<8x256xf32>
    %64 = arith.mulf %63, %60 : vector<8x256xf32>
    %65 = vector.broadcast %62 : vector<8x1xf32> to vector<8x256xf32>
    %66 = arith.mulf %65, %64 : vector<8x256xf32>
    %67 = arith.addf %59, %66 : vector<8x256xf32>
    %c55_i32 = arith.constant 55 : i32
    %68 = tpu.dynamic_rotate %0 by %c55_i32 dim 1 : vector<8x256xf32>, i32 -> vector<8x256xf32>
    %c8 = arith.constant 8 : index
    %c0_27 = arith.constant 0 : index
    %69 = vector.load %arg2[%c8, %c0_27] : memref<27x256xf32, #tpu.memory_space<vmem>>, vector<1x256xf32>
    %c0_28 = arith.constant 0 : index
    %c8_29 = arith.constant 8 : index
    %70 = vector.load %arg3[%c0_28, %c8_29] : memref<8x27xf32, #tpu.memory_space<vmem>>, vector<8x1xf32>
    %71 = vector.broadcast %69 : vector<1x256xf32> to vector<8x256xf32>
    %72 = arith.mulf %71, %68 : vector<8x256xf32>
    %73 = vector.broadcast %70 : vector<8x1xf32> to vector<8x256xf32>
    %74 = arith.mulf %73, %72 : vector<8x256xf32>
    %75 = arith.addf %67, %74 : vector<8x256xf32>
    %c9_i32 = arith.constant 9 : i32
    %76 = tpu.dynamic_rotate %0 by %c9_i32 dim 1 : vector<8x256xf32>, i32 -> vector<8x256xf32>
    %c9 = arith.constant 9 : index
    %c0_30 = arith.constant 0 : index
    %77 = vector.load %arg2[%c9, %c0_30] : memref<27x256xf32, #tpu.memory_space<vmem>>, vector<1x256xf32>
    %c0_31 = arith.constant 0 : index
    %c9_32 = arith.constant 9 : index
    %78 = vector.load %arg3[%c0_31, %c9_32] : memref<8x27xf32, #tpu.memory_space<vmem>>, vector<8x1xf32>
    %79 = vector.broadcast %77 : vector<1x256xf32> to vector<8x256xf32>
    %80 = arith.mulf %79, %76 : vector<8x256xf32>
    %81 = vector.broadcast %78 : vector<8x1xf32> to vector<8x256xf32>
    %82 = arith.mulf %81, %80 : vector<8x256xf32>
    %83 = arith.addf %75, %82 : vector<8x256xf32>
    %c8_i32 = arith.constant 8 : i32
    %84 = tpu.dynamic_rotate %0 by %c8_i32 dim 1 : vector<8x256xf32>, i32 -> vector<8x256xf32>
    %c10 = arith.constant 10 : index
    %c0_33 = arith.constant 0 : index
    %85 = vector.load %arg2[%c10, %c0_33] : memref<27x256xf32, #tpu.memory_space<vmem>>, vector<1x256xf32>
    %c0_34 = arith.constant 0 : index
    %c10_35 = arith.constant 10 : index
    %86 = vector.load %arg3[%c0_34, %c10_35] : memref<8x27xf32, #tpu.memory_space<vmem>>, vector<8x1xf32>
    %87 = vector.broadcast %85 : vector<1x256xf32> to vector<8x256xf32>
    %88 = arith.mulf %87, %84 : vector<8x256xf32>
    %89 = vector.broadcast %86 : vector<8x1xf32> to vector<8x256xf32>
    %90 = arith.mulf %89, %88 : vector<8x256xf32>
    %91 = arith.addf %83, %90 : vector<8x256xf32>
    %c7_i32 = arith.constant 7 : i32
    %92 = tpu.dynamic_rotate %0 by %c7_i32 dim 1 : vector<8x256xf32>, i32 -> vector<8x256xf32>
    %c11 = arith.constant 11 : index
    %c0_36 = arith.constant 0 : index
    %93 = vector.load %arg2[%c11, %c0_36] : memref<27x256xf32, #tpu.memory_space<vmem>>, vector<1x256xf32>
    %c0_37 = arith.constant 0 : index
    %c11_38 = arith.constant 11 : index
    %94 = vector.load %arg3[%c0_37, %c11_38] : memref<8x27xf32, #tpu.memory_space<vmem>>, vector<8x1xf32>
    %95 = vector.broadcast %93 : vector<1x256xf32> to vector<8x256xf32>
    %96 = arith.mulf %95, %92 : vector<8x256xf32>
    %97 = vector.broadcast %94 : vector<8x1xf32> to vector<8x256xf32>
    %98 = arith.mulf %97, %96 : vector<8x256xf32>
    %99 = arith.addf %91, %98 : vector<8x256xf32>
    %c1_i32 = arith.constant 1 : i32
    %100 = tpu.dynamic_rotate %0 by %c1_i32 dim 1 : vector<8x256xf32>, i32 -> vector<8x256xf32>
    %c12 = arith.constant 12 : index
    %c0_39 = arith.constant 0 : index
    %101 = vector.load %arg2[%c12, %c0_39] : memref<27x256xf32, #tpu.memory_space<vmem>>, vector<1x256xf32>
    %c0_40 = arith.constant 0 : index
    %c12_41 = arith.constant 12 : index
    %102 = vector.load %arg3[%c0_40, %c12_41] : memref<8x27xf32, #tpu.memory_space<vmem>>, vector<8x1xf32>
    %103 = vector.broadcast %101 : vector<1x256xf32> to vector<8x256xf32>
    %104 = arith.mulf %103, %100 : vector<8x256xf32>
    %105 = vector.broadcast %102 : vector<8x1xf32> to vector<8x256xf32>
    %106 = arith.mulf %105, %104 : vector<8x256xf32>
    %107 = arith.addf %99, %106 : vector<8x256xf32>
    %c255_i32 = arith.constant 255 : i32
    %108 = tpu.dynamic_rotate %0 by %c255_i32 dim 1 : vector<8x256xf32>, i32 -> vector<8x256xf32>
    %c14 = arith.constant 14 : index
    %c0_42 = arith.constant 0 : index
    %109 = vector.load %arg2[%c14, %c0_42] : memref<27x256xf32, #tpu.memory_space<vmem>>, vector<1x256xf32>
    %c0_43 = arith.constant 0 : index
    %c14_44 = arith.constant 14 : index
    %110 = vector.load %arg3[%c0_43, %c14_44] : memref<8x27xf32, #tpu.memory_space<vmem>>, vector<8x1xf32>
    %111 = vector.broadcast %109 : vector<1x256xf32> to vector<8x256xf32>
    %112 = arith.mulf %111, %108 : vector<8x256xf32>
    %113 = vector.broadcast %110 : vector<8x1xf32> to vector<8x256xf32>
    %114 = arith.mulf %113, %112 : vector<8x256xf32>
    %115 = arith.addf %107, %114 : vector<8x256xf32>
    %c249_i32 = arith.constant 249 : i32
    %116 = tpu.dynamic_rotate %0 by %c249_i32 dim 1 : vector<8x256xf32>, i32 -> vector<8x256xf32>
    %c15 = arith.constant 15 : index
    %c0_45 = arith.constant 0 : index
    %117 = vector.load %arg2[%c15, %c0_45] : memref<27x256xf32, #tpu.memory_space<vmem>>, vector<1x256xf32>
    %c0_46 = arith.constant 0 : index
    %c15_47 = arith.constant 15 : index
    %118 = vector.load %arg3[%c0_46, %c15_47] : memref<8x27xf32, #tpu.memory_space<vmem>>, vector<8x1xf32>
    %119 = vector.broadcast %117 : vector<1x256xf32> to vector<8x256xf32>
    %120 = arith.mulf %119, %116 : vector<8x256xf32>
    %121 = vector.broadcast %118 : vector<8x1xf32> to vector<8x256xf32>
    %122 = arith.mulf %121, %120 : vector<8x256xf32>
    %123 = arith.addf %115, %122 : vector<8x256xf32>
    %c248_i32 = arith.constant 248 : i32
    %124 = tpu.dynamic_rotate %0 by %c248_i32 dim 1 : vector<8x256xf32>, i32 -> vector<8x256xf32>
    %c16 = arith.constant 16 : index
    %c0_48 = arith.constant 0 : index
    %125 = vector.load %arg2[%c16, %c0_48] : memref<27x256xf32, #tpu.memory_space<vmem>>, vector<1x256xf32>
    %c0_49 = arith.constant 0 : index
    %c16_50 = arith.constant 16 : index
    %126 = vector.load %arg3[%c0_49, %c16_50] : memref<8x27xf32, #tpu.memory_space<vmem>>, vector<8x1xf32>
    %127 = vector.broadcast %125 : vector<1x256xf32> to vector<8x256xf32>
    %128 = arith.mulf %127, %124 : vector<8x256xf32>
    %129 = vector.broadcast %126 : vector<8x1xf32> to vector<8x256xf32>
    %130 = arith.mulf %129, %128 : vector<8x256xf32>
    %131 = arith.addf %123, %130 : vector<8x256xf32>
    %c247_i32 = arith.constant 247 : i32
    %132 = tpu.dynamic_rotate %0 by %c247_i32 dim 1 : vector<8x256xf32>, i32 -> vector<8x256xf32>
    %c17 = arith.constant 17 : index
    %c0_51 = arith.constant 0 : index
    %133 = vector.load %arg2[%c17, %c0_51] : memref<27x256xf32, #tpu.memory_space<vmem>>, vector<1x256xf32>
    %c0_52 = arith.constant 0 : index
    %c17_53 = arith.constant 17 : index
    %134 = vector.load %arg3[%c0_52, %c17_53] : memref<8x27xf32, #tpu.memory_space<vmem>>, vector<8x1xf32>
    %135 = vector.broadcast %133 : vector<1x256xf32> to vector<8x256xf32>
    %136 = arith.mulf %135, %132 : vector<8x256xf32>
    %137 = vector.broadcast %134 : vector<8x1xf32> to vector<8x256xf32>
    %138 = arith.mulf %137, %136 : vector<8x256xf32>
    %139 = arith.addf %131, %138 : vector<8x256xf32>
    %c201_i32 = arith.constant 201 : i32
    %140 = tpu.dynamic_rotate %0 by %c201_i32 dim 1 : vector<8x256xf32>, i32 -> vector<8x256xf32>
    %c18 = arith.constant 18 : index
    %c0_54 = arith.constant 0 : index
    %141 = vector.load %arg2[%c18, %c0_54] : memref<27x256xf32, #tpu.memory_space<vmem>>, vector<1x256xf32>
    %c0_55 = arith.constant 0 : index
    %c18_56 = arith.constant 18 : index
    %142 = vector.load %arg3[%c0_55, %c18_56] : memref<8x27xf32, #tpu.memory_space<vmem>>, vector<8x1xf32>
    %143 = vector.broadcast %141 : vector<1x256xf32> to vector<8x256xf32>
    %144 = arith.mulf %143, %140 : vector<8x256xf32>
    %145 = vector.broadcast %142 : vector<8x1xf32> to vector<8x256xf32>
    %146 = arith.mulf %145, %144 : vector<8x256xf32>
    %147 = arith.addf %139, %146 : vector<8x256xf32>
    %c200_i32 = arith.constant 200 : i32
    %148 = tpu.dynamic_rotate %0 by %c200_i32 dim 1 : vector<8x256xf32>, i32 -> vector<8x256xf32>
    %c19 = arith.constant 19 : index
    %c0_57 = arith.constant 0 : index
    %149 = vector.load %arg2[%c19, %c0_57] : memref<27x256xf32, #tpu.memory_space<vmem>>, vector<1x256xf32>
    %c0_58 = arith.constant 0 : index
    %c19_59 = arith.constant 19 : index
    %150 = vector.load %arg3[%c0_58, %c19_59] : memref<8x27xf32, #tpu.memory_space<vmem>>, vector<8x1xf32>
    %151 = vector.broadcast %149 : vector<1x256xf32> to vector<8x256xf32>
    %152 = arith.mulf %151, %148 : vector<8x256xf32>
    %153 = vector.broadcast %150 : vector<8x1xf32> to vector<8x256xf32>
    %154 = arith.mulf %153, %152 : vector<8x256xf32>
    %155 = arith.addf %147, %154 : vector<8x256xf32>
    %c199_i32 = arith.constant 199 : i32
    %156 = tpu.dynamic_rotate %0 by %c199_i32 dim 1 : vector<8x256xf32>, i32 -> vector<8x256xf32>
    %c20 = arith.constant 20 : index
    %c0_60 = arith.constant 0 : index
    %157 = vector.load %arg2[%c20, %c0_60] : memref<27x256xf32, #tpu.memory_space<vmem>>, vector<1x256xf32>
    %c0_61 = arith.constant 0 : index
    %c20_62 = arith.constant 20 : index
    %158 = vector.load %arg3[%c0_61, %c20_62] : memref<8x27xf32, #tpu.memory_space<vmem>>, vector<8x1xf32>
    %159 = vector.broadcast %157 : vector<1x256xf32> to vector<8x256xf32>
    %160 = arith.mulf %159, %156 : vector<8x256xf32>
    %161 = vector.broadcast %158 : vector<8x1xf32> to vector<8x256xf32>
    %162 = arith.mulf %161, %160 : vector<8x256xf32>
    %163 = arith.addf %155, %162 : vector<8x256xf32>
    %c193_i32 = arith.constant 193 : i32
    %164 = tpu.dynamic_rotate %0 by %c193_i32 dim 1 : vector<8x256xf32>, i32 -> vector<8x256xf32>
    %c21 = arith.constant 21 : index
    %c0_63 = arith.constant 0 : index
    %165 = vector.load %arg2[%c21, %c0_63] : memref<27x256xf32, #tpu.memory_space<vmem>>, vector<1x256xf32>
    %c0_64 = arith.constant 0 : index
    %c21_65 = arith.constant 21 : index
    %166 = vector.load %arg3[%c0_64, %c21_65] : memref<8x27xf32, #tpu.memory_space<vmem>>, vector<8x1xf32>
    %167 = vector.broadcast %165 : vector<1x256xf32> to vector<8x256xf32>
    %168 = arith.mulf %167, %164 : vector<8x256xf32>
    %169 = vector.broadcast %166 : vector<8x1xf32> to vector<8x256xf32>
    %170 = arith.mulf %169, %168 : vector<8x256xf32>
    %171 = arith.addf %163, %170 : vector<8x256xf32>
    %c192_i32 = arith.constant 192 : i32
    %172 = tpu.dynamic_rotate %0 by %c192_i32 dim 1 : vector<8x256xf32>, i32 -> vector<8x256xf32>
    %c22 = arith.constant 22 : index
    %c0_66 = arith.constant 0 : index
    %173 = vector.load %arg2[%c22, %c0_66] : memref<27x256xf32, #tpu.memory_space<vmem>>, vector<1x256xf32>
    %c0_67 = arith.constant 0 : index
    %c22_68 = arith.constant 22 : index
    %174 = vector.load %arg3[%c0_67, %c22_68] : memref<8x27xf32, #tpu.memory_space<vmem>>, vector<8x1xf32>
    %175 = vector.broadcast %173 : vector<1x256xf32> to vector<8x256xf32>
    %176 = arith.mulf %175, %172 : vector<8x256xf32>
    %177 = vector.broadcast %174 : vector<8x1xf32> to vector<8x256xf32>
    %178 = arith.mulf %177, %176 : vector<8x256xf32>
    %179 = arith.addf %171, %178 : vector<8x256xf32>
    %c191_i32 = arith.constant 191 : i32
    %180 = tpu.dynamic_rotate %0 by %c191_i32 dim 1 : vector<8x256xf32>, i32 -> vector<8x256xf32>
    %c23 = arith.constant 23 : index
    %c0_69 = arith.constant 0 : index
    %181 = vector.load %arg2[%c23, %c0_69] : memref<27x256xf32, #tpu.memory_space<vmem>>, vector<1x256xf32>
    %c0_70 = arith.constant 0 : index
    %c23_71 = arith.constant 23 : index
    %182 = vector.load %arg3[%c0_70, %c23_71] : memref<8x27xf32, #tpu.memory_space<vmem>>, vector<8x1xf32>
    %183 = vector.broadcast %181 : vector<1x256xf32> to vector<8x256xf32>
    %184 = arith.mulf %183, %180 : vector<8x256xf32>
    %185 = vector.broadcast %182 : vector<8x1xf32> to vector<8x256xf32>
    %186 = arith.mulf %185, %184 : vector<8x256xf32>
    %187 = arith.addf %179, %186 : vector<8x256xf32>
    %c185_i32 = arith.constant 185 : i32
    %188 = tpu.dynamic_rotate %0 by %c185_i32 dim 1 : vector<8x256xf32>, i32 -> vector<8x256xf32>
    %c24 = arith.constant 24 : index
    %c0_72 = arith.constant 0 : index
    %189 = vector.load %arg2[%c24, %c0_72] : memref<27x256xf32, #tpu.memory_space<vmem>>, vector<1x256xf32>
    %c0_73 = arith.constant 0 : index
    %c24_74 = arith.constant 24 : index
    %190 = vector.load %arg3[%c0_73, %c24_74] : memref<8x27xf32, #tpu.memory_space<vmem>>, vector<8x1xf32>
    %191 = vector.broadcast %189 : vector<1x256xf32> to vector<8x256xf32>
    %192 = arith.mulf %191, %188 : vector<8x256xf32>
    %193 = vector.broadcast %190 : vector<8x1xf32> to vector<8x256xf32>
    %194 = arith.mulf %193, %192 : vector<8x256xf32>
    %195 = arith.addf %187, %194 : vector<8x256xf32>
    %c184_i32 = arith.constant 184 : i32
    %196 = tpu.dynamic_rotate %0 by %c184_i32 dim 1 : vector<8x256xf32>, i32 -> vector<8x256xf32>
    %c25 = arith.constant 25 : index
    %c0_75 = arith.constant 0 : index
    %197 = vector.load %arg2[%c25, %c0_75] : memref<27x256xf32, #tpu.memory_space<vmem>>, vector<1x256xf32>
    %c0_76 = arith.constant 0 : index
    %c25_77 = arith.constant 25 : index
    %198 = vector.load %arg3[%c0_76, %c25_77] : memref<8x27xf32, #tpu.memory_space<vmem>>, vector<8x1xf32>
    %199 = vector.broadcast %197 : vector<1x256xf32> to vector<8x256xf32>
    %200 = arith.mulf %199, %196 : vector<8x256xf32>
    %201 = vector.broadcast %198 : vector<8x1xf32> to vector<8x256xf32>
    %202 = arith.mulf %201, %200 : vector<8x256xf32>
    %203 = arith.addf %195, %202 : vector<8x256xf32>
    %c183_i32 = arith.constant 183 : i32
    %204 = tpu.dynamic_rotate %0 by %c183_i32 dim 1 : vector<8x256xf32>, i32 -> vector<8x256xf32>
    %c26 = arith.constant 26 : index
    %c0_78 = arith.constant 0 : index
    %205 = vector.load %arg2[%c26, %c0_78] : memref<27x256xf32, #tpu.memory_space<vmem>>, vector<1x256xf32>
    %c0_79 = arith.constant 0 : index
    %c26_80 = arith.constant 26 : index
    %206 = vector.load %arg3[%c0_79, %c26_80] : memref<8x27xf32, #tpu.memory_space<vmem>>, vector<8x1xf32>
    %207 = vector.broadcast %205 : vector<1x256xf32> to vector<8x256xf32>
    %208 = arith.mulf %207, %204 : vector<8x256xf32>
    %209 = vector.broadcast %206 : vector<8x1xf32> to vector<8x256xf32>
    %210 = arith.mulf %209, %208 : vector<8x256xf32>
    %211 = arith.addf %203, %210 : vector<8x256xf32>
    %c0_81 = arith.constant 0 : index
    %c0_82 = arith.constant 0 : index
    %212 = vector.load %arg4[%c0_81, %c0_82] : memref<8x8xf32, #tpu.memory_space<vmem>>, vector<8x8xf32>
    %cst = arith.constant dense<0.000000e+00> : vector<8x256xf32>
    %213 = tpu.matmul %212, %211, %cst {dimension_numbers = #tpu.dot_dimension_numbers<[1], [0], [0], [1], [0, 0, 1, 1], [], []>} : vector<8x8xf32>, vector<8x256xf32>, vector<8x256xf32> -> vector<8x256xf32>
    %c0_83 = arith.constant 0 : index
    %c0_84 = arith.constant 0 : index
    %214 = vector.load %arg5[%c0_83, %c0_84] : memref<8x1xf32, #tpu.memory_space<vmem>>, vector<8x1xf32>
    %215 = vector.broadcast %214 : vector<8x1xf32> to vector<8x256xf32>
    %216 = arith.addf %213, %215 : vector<8x256xf32>
    %cst_85 = arith.constant 0.000000e+00 : f32
    %cst_86 = arith.constant 6.000000e+00 : f32
    %217 = vector.broadcast %cst_85 : f32 to vector<8x256xf32>
    %218 = arith.maximumf %217, %216 : vector<8x256xf32>
    %219 = vector.broadcast %cst_86 : f32 to vector<8x256xf32>
    %220 = arith.minimumf %219, %218 : vector<8x256xf32>
    %221 = arith.addf %0, %220 : vector<8x256xf32>
    %c0_87 = arith.constant 0 : index
    %c0_88 = arith.constant 0 : index
    %222 = vector.load %arg6[%c0_87, %c0_88] : memref<8x256xf32, #tpu.memory_space<vmem>>, vector<8x256xf32>
    tpu.vector_store %arg6[%c0_87, %c0_88], %221 {strides = array<i32>} : memref<8x256xf32, #tpu.memory_space<vmem>>, vector<8x256xf32>,
    return
  }
  func.func @transform_0(%arg0: i32) -> (i32, i32) {
    %c0_i32 = arith.constant 0 : i32
    %c0_i32_0 = arith.constant 0 : i32
    return %arg0, %c0_i32 : i32, i32
  }
  func.func @transform_1(%arg0: i32) -> (i32, i32) {
    %c0_i32 = arith.constant 0 : i32
    %c0_i32_0 = arith.constant 0 : i32
    %c0_i32_1 = arith.constant 0 : i32
    return %c0_i32, %c0_i32_0 : i32, i32
  }
  func.func @transform_2(%arg0: i32) -> (i32, i32) {
    %c0_i32 = arith.constant 0 : i32
    %c0_i32_0 = arith.constant 0 : i32
    %c0_i32_1 = arith.constant 0 : i32
    return %c0_i32, %c0_i32_0 : i32, i32
  }
  func.func @transform_3(%arg0: i32) -> (i32, i32) {
    %c0_i32 = arith.constant 0 : i32
    %c0_i32_0 = arith.constant 0 : i32
    %c0_i32_1 = arith.constant 0 : i32
    return %c0_i32, %c0_i32_0 : i32, i32
  }
  func.func @transform_4(%arg0: i32) -> (i32, i32) {
    %c0_i32 = arith.constant 0 : i32
    %c0_i32_0 = arith.constant 0 : i32
    %c0_i32_1 = arith.constant 0 : i32
    return %c0_i32, %c0_i32_0 : i32, i32
  }
  func.func @transform_5(%arg0: i32) -> (i32, i32) {
    %c0_i32 = arith.constant 0 : i32
    %c0_i32_0 = arith.constant 0 : i32
    return %arg0, %c0_i32 : i32, i32
  }
}

</mosaic_0001>

<bundles_post_ra>
// kernel: tpu_custom_call.1
= control target key start
LH: loop header
LB: loop body
LE: loop exit
PB: predicated region body
PF: predicated region fallthrough
CT: control target
= control target key end

     0   :  { %10 = vsyncpa [#allocation3], 0  ;;  %s1456_s0 = inlined_call_operand.hbm [shape: f32[8,256], index: 0, kind: input, shape index: {}, may-alias: {0,5}]   ;;  %s1457_s1 = inlined_call_operand.hbm [shape: f32[27,256], index: 1, kind: input, shape index: {}]   ;;  %s1458_s2 = inlined_call_operand.vmem [shape: f32[8,27], index: 2, kind: input, shape index: {}]   ;;  %s1459_s3 = inlined_call_operand.vmem [shape: f32[8,8], index: 3, kind: input, shape index: {}]   ;;  %s1460_s4 = inlined_call_operand.vmem [shape: f32[8,1], index: 4, kind: input, shape index: {}]   ;;  %s1461_s5 = inlined_call_operand.hbm [shape: f32[8,256], index: 5, kind: output, shape index: {}, may-alias: {0,5}]  }
   0x1   :  { %11 = vsyncpa [#allocation6], 0 }
   0x2   :  { %12 = vsyncpa [#allocation4], 0  ;;  %s1033_s18 = smov [#allocation2]   ;;  %s1034_s20 = smov [#allocation5]  }
   0x3   :  { %s19_s19 = sshll.u32 %s1033_s18, 4  ;;  %s28_s21 = sshll.u32 %s1034_s20, 4  ;;  %s20_s19 = int_to_ptr.vmem [resolvable:$true] %s19_s19  ;;  %s1113_s21 = int_to_ptr.vmem [resolvable:$true] %s28_s21 }
   0x4   :  { %s961_s24 = scalar_lea.hbm %s1456_s0, 256 }
   0x5   :  { %p962_p0 = scmp.ne.s32.totalorder %s1456_s0, %s961_s24  ;;  %p965_p1 = scmp.lt.u32.totalorder %s961_s24, %s1456_s0 }
   0x7   :  { %p967_p2 = pnand %p965_p1, %p962_p0 }
   0x9   :  { %970 = shalt.err (!%p967_p2)
}
   0xa   :  { %s971_s29 = scalar_lea.vmem %s20_s19, 256  ;;  %p976_p4 = scmp.lt.s32.totalorder %s20_s19, %s20_s19 }
   0xb   :  { %p972_p3 = scmp.ne.s32.totalorder %s20_s19, %s971_s29  ;;  %p977_p5 = scmp.lt.s32.totalorder %s971_s29, %s971_s29 }
   0xd   :  { %p978_p6 = por %p977_p5, %p976_p4 }
   0xf   :  { %p979_p7 = pnand %p978_p6, %p972_p3 }
  0x11   :  { %982 = shalt.err (!%p979_p7)
}
  0x12   :  { %22 = dma.hbm_to_vmem [thread:$0]  %s1456_s0, 256, %s20_s19, [#allocation3]  }
  0x13   :  { %s983_s9 = scalar_lea.hbm %s1457_s1, 1024 }
  0x14   :  { %p984_p8 = scmp.ne.s32.totalorder %s1457_s1, %s983_s9  ;;  %p987_p9 = scmp.lt.u32.totalorder %s983_s9, %s1457_s1 }
  0x16   :  { %p989_p10 = pnand %p987_p9, %p984_p8 }
  0x18   :  { %992 = shalt.err (!%p989_p10)
}
  0x19   :  { %s993_s14 = scalar_lea.vmem %s1113_s21, 1024  ;;  %p998_p12 = scmp.lt.s32.totalorder %s1113_s21, %s1113_s21 }
  0x1a   :  { %p994_p11 = scmp.ne.s32.totalorder %s1113_s21, %s993_s14  ;;  %p999_p13 = scmp.lt.s32.totalorder %s993_s14, %s993_s14 }
  0x1c   :  { %p1000_p0 = por %p999_p13, %p998_p12 }
  0x1e   :  { %p1001_p1 = pnand %p1000_p0, %p994_p11 }
  0x20   :  { %1004 = shalt.err (!%p1001_p1)
}
  0x21   :  { %s1035_s0 = smov 256   ;;  %s1036_s15 = smov 16  }
  0x22   :  { %34 = dma.hbm_to_vmem [thread:$0]  %s1457_s1, 1024, %s1113_s21, [#allocation6], %s1035_s0, %s1035_s0, %s1036_s15  }
  0x23   :  { %1027 = dma.done.wait [#allocation3], 256  }
  0x24   :  { %1028 = vsyncadd [#allocation3], 4294967040 }
  0x25   :  { %1029 = dma.done.wait [#allocation6], 1024  }
  0x26   :  { %1030 = vsyncadd [#allocation6], 4294966272  ;;  %v1037_v0 = vmov 1   ;;  %v1038_v1 = vmov 13   ;;  %v1147_v2 = vld [vmem:[%s1458_s2] sm:$0xff]  ;;  %v1039_v4 = vmov 0   ;;  %v61_v26 = vlaneseq }
  0x27   :  { %934 = vset.pattern.permute.xlu1 %v1037_v0  ;;  %932 = vset.pattern.permute.xlu0 %v1038_v1  ;;  %v1151_v3 = vld [vmem:[#allocation2] sm:$0xff]  ;;  %s1040_s1 = smov 73   ;;  %v1156_v5 = vld [vmem:[#allocation2 + $0x8] sm:$0xff]  ;;  %v1041_v6 = vmov 2   ;;  %v1042_v7 = vmov 20   ;;  %s1043_s2 = smov 72  }
  0x28   :  { %111 = vperm.xlu1 %934, %v1147_v2   ;;  %52 = vperm.xlu0 %932, %v1147_v2   ;;  %1466 = vst [vmem:[#allocation11_spill] sm:$0xff] %v1151_v3  ;;  %1467 = vst [vmem:[#allocation12_spill] sm:$0xff] %v1156_v5  ;;  %v1044_v8 = vmov 3   ;;  %v1045_v9 = vmov 4   ;;  %s1046_s20 = smov 71   ;;  %v1047_v10 = vmov 5  }
  0x29   :  { %s1048_s21 = smov 65   ;;  %v1049_v11 = vmov 6   ;;  %v1050_v12 = vmov 7   ;;  %s1051_s22 = smov 64   ;;  %v1052_v13 = vmov 8   ;;  %v1053_v14 = vmov 9  }
  0x2a   :  { %s1054_s23 = smov 63   ;;  %v1055_v15 = vmov 10   ;;  %s1056_s24 = smov 57   ;;  %v1057_v16 = vmov 11   ;;  %v1058_v17 = vmov 12   ;;  %v1060_v18 = vmov 14  }
  0x2b   :  { %s1059_s25 = smov 56   ;;  %s1061_s26 = smov 55   ;;  %v1062_v19 = vmov 15   ;;  %v1063_v20 = vmov 16   ;;  %v1065_v21 = vmov 17   ;;  %v1066_v22 = vmov 18  }
  0x2c   :  { %933 = vset.pattern.permute.xlu0 %v1039_v4  ;;  %57 = vrot.lane.b32.xlu1 %v1151_v3, %s1040_s1  ;;  %s1064_s27 = smov 9   ;;  %s1067_s28 = smov 8   ;;  %v1068_v23 = vmov 19   ;;  %v1070_v24 = vmov 22   ;;  %v1071_v25 = vmov 25   ;;  %v69_v28 = vshrl.u32 %v61_v26, 7 }
  0x2d   :  { %81 = vperm.xlu0 %933, %v1147_v2   ;;  %952 = vset.pattern.permute.xlu1 %v1042_v7  ;;  %s1069_s29 = smov 7   ;;  %s1072_s30 = smov 1   ;;  %v1209_v29 = vand.u32 127, %v61_v26  ;;  %v66_v33 = vld [vmem:[#allocation5] ss:$8 sm:$0x3] }
  0x2e   :  { %s1073_s6 = smov 127   ;;  %s1074_s7 = smov 121   ;;  %v1211_v31 = vsub.s32 0, %v69_v28  ;;  %v1213_v32 = vsub.s32 1, %v69_v28  ;;  %v1077_v54 = vmov 21   ;;  %v1078_v63 = vmov 23  }
  0x2f   :  { %s1075_s8 = smov 120   ;;  %s1076_s9 = smov 119   ;;  %vm63_vm0 = vcmp.lt.s32.totalorder %v1209_v29, 73  ;;  %v96_v40 = vld [vmem:[#allocation5 + $0x1] ss:$8 sm:$0x3] }
  0x30   :  { %59 = vrot.lane.b32.xlu1 %v1156_v5, %s1040_s1  ;;  %v71_v35 = vrot.slane %v66_v33, %v1211_v31  ;;  %v75_v36 = vrot.slane %v66_v33, %v1213_v32  ;;  %vm92_vm1 = vcmp.lt.s32.totalorder %v1209_v29, 72  ;;  %v101_v45 = vrot.slane %v96_v40, %v1211_v31  ;;  %v126_v57 = vld [vmem:[#allocation5 + $0x2] ss:$8 sm:$0x3]  ;;  %s1082_s13 = smov [#allocation7]  }
  0x31   :  { %935 = vset.pattern.permute.xlu0 %v1041_v6  ;;  %v105_v46 = vrot.slane %v96_v40, %v1213_v32  ;;  %vm122_vm2 = vcmp.lt.s32.totalorder %v1209_v29, 71  ;;  %v131_v0 = vrot.slane %v126_v57, %v1211_v31  ;;  %v135_v1 = vrot.slane %v126_v57, %v1213_v32  ;;  %v186_v33 = vld [vmem:[#allocation5 + $0x4] ss:$8 sm:$0x3]  ;;  %s871_s14 = sshll.u32 %s1082_s13, 4  ;;  %s872_s14 = int_to_ptr.vmem [resolvable:$true] %s871_s14 }
  0x32   :  { %141 = vperm.xlu0 %935, %v1147_v2   ;;  %vm152_vm3 = vcmp.lt.s32.totalorder %v1209_v29, 65  ;;  %vm182_vm4 = vcmp.lt.s32.totalorder %v1209_v29, 64  ;;  %vm212_vm5 = vcmp.lt.s32.totalorder %v1209_v29, 63  ;;  %vm242_vm6 = vcmp.lt.s32.totalorder %v1209_v29, 57  ;;  %p1010_p3 = scmp.lt.s32.totalorder %s872_s14, %s872_s14 }
  0x33   :  { %vm272_vm7 = vcmp.lt.s32.totalorder %v1209_v29, 56  ;;  %vm302_vm8 = vcmp.lt.s32.totalorder %v1209_v29, 55  ;;  %vm332_vm9 = vcmp.lt.s32.totalorder %v1209_v29, 9  ;;  %vm362_vm10 = vcmp.lt.s32.totalorder %v1209_v29, 8 }
  0x34   :  { %88 = vrot.lane.b32.xlu1 %v1151_v3, %s1043_s2  ;;  %vm392_vm11 = vcmp.lt.s32.totalorder %v1209_v29, 7  ;;  %vm422_vm12 = vcmp.lt.s32.totalorder %v1209_v29, 1  ;;  %vm452_vm13 = vcmp.lt.s32.totalorder %v1209_v29, 127  ;;  %vm482_vm14 = vcmp.lt.s32.totalorder %v1209_v29, 121 }
  0x35   :  { %vm512_vm15 = vcmp.lt.s32.totalorder %v1209_v29, 120 }
  0x36   :  { %936 = vset.pattern.permute.xlu0 %v1044_v8 }
  0x37   :  { %171 = vperm.xlu0 %936, %v1147_v2  }
  0x38   :  { %90 = vrot.lane.b32.xlu1 %v1156_v5, %s1043_s2 }
  0x3b   :  { %937 = vset.pattern.permute.xlu0 %v1045_v9 }
  0x3c   :  { %201 = vperm.xlu0 %937, %v1147_v2   ;;  %118 = vrot.lane.b32.xlu1 %v1151_v3, %s1046_s20 }
  0x40   :  { %938 = vset.pattern.permute.xlu0 %v1047_v10  ;;  %120 = vrot.lane.b32.xlu1 %v1156_v5, %s1046_s20 }
  0x41   :  { %231 = vperm.xlu0 %938, %v1147_v2  }
  0x44   :  { %148 = vrot.lane.b32.xlu1 %v1151_v3, %s1048_s21 }
  0x45   :  { %939 = vset.pattern.permute.xlu0 %v1049_v11 }
  0x46   :  { %261 = vperm.xlu0 %939, %v1147_v2  }
  0x48   :  { %150 = vrot.lane.b32.xlu1 %v1156_v5, %s1048_s21 }
  0x4a   :  { %940 = vset.pattern.permute.xlu0 %v1050_v12 }
  0x4b   :  { %291 = vperm.xlu0 %940, %v1147_v2  }
  0x4c   :  { %178 = vrot.lane.b32.xlu1 %v1151_v3, %s1051_s22 }
  0x4f   :  { %941 = vset.pattern.permute.xlu0 %v1052_v13 }
  0x50   :  { %321 = vperm.xlu0 %941, %v1147_v2   ;;  %180 = vrot.lane.b32.xlu1 %v1156_v5, %s1051_s22 }
  0x54   :  { %942 = vset.pattern.permute.xlu0 %v1053_v14  ;;  %208 = vrot.lane.b32.xlu1 %v1151_v3, %s1054_s23  ;;  %v1079_v14 = vmov 24  }
  0x55   :  { %351 = vperm.xlu0 %942, %v1147_v2  }
  0x58   :  { %210 = vrot.lane.b32.xlu1 %v1156_v5, %s1054_s23 }
  0x59   :  { %943 = vset.pattern.permute.xlu0 %v1055_v15  ;;  %v156_v15 = vld [vmem:[#allocation5 + $0x3] ss:$8 sm:$0x3] }
  0x5a   :  { %381 = vperm.xlu0 %943, %v1147_v2  }
  0x5c   :  { %238 = vrot.lane.b32.xlu1 %v1151_v3, %s1056_s24 }
  0x5e   :  { %944 = vset.pattern.permute.xlu0 %v1057_v16 }
  0x5f   :  { %411 = vperm.xlu0 %944, %v1147_v2  }
  0x60   :  { %240 = vrot.lane.b32.xlu1 %v1156_v5, %s1056_s24 }
  0x63   :  { %945 = vset.pattern.permute.xlu0 %v1058_v17 }
  0x64   :  { %441 = vperm.xlu0 %945, %v1147_v2   ;;  %268 = vrot.lane.b32.xlu1 %v1151_v3, %s1059_s25 }
  0x68   :  { %946 = vset.pattern.permute.xlu0 %v1060_v18  ;;  %270 = vrot.lane.b32.xlu1 %v1156_v5, %s1059_s25 }
  0x69   :  { %471 = vperm.xlu0 %946, %v1147_v2  }
  0x6c   :  { %298 = vrot.lane.b32.xlu1 %v1151_v3, %s1061_s26 }
  0x6d   :  { %947 = vset.pattern.permute.xlu0 %v1062_v19 }
  0x6e   :  { %501 = vperm.xlu0 %947, %v1147_v2  }
  0x70   :  { %300 = vrot.lane.b32.xlu1 %v1156_v5, %s1061_s26 }
  0x72   :  { %948 = vset.pattern.permute.xlu0 %v1063_v20 }
  0x73   :  { %531 = vperm.xlu0 %948, %v1147_v2  }
  0x74   :  { %328 = vrot.lane.b32.xlu1 %v1151_v3, %s1064_s27 }
  0x77   :  { %949 = vset.pattern.permute.xlu0 %v1065_v21  ;;  %v161_v21 = vrot.slane %v156_v15, %v1211_v31 }
  0x78   :  { %561 = vperm.xlu0 %949, %v1147_v2   ;;  %330 = vrot.lane.b32.xlu1 %v1156_v5, %s1064_s27 }
  0x7c   :  { %950 = vset.pattern.permute.xlu0 %v1066_v22  ;;  %358 = vrot.lane.b32.xlu1 %v1151_v3, %s1067_s28  ;;  %v165_v22 = vrot.slane %v156_v15, %v1213_v32 }
  0x7d   :  { %584 = vperm.xlu0 %950, %v1147_v2  }
  0x80   :  { %360 = vrot.lane.b32.xlu1 %v1156_v5, %s1067_s28 }
  0x81   :  { %951 = vset.pattern.permute.xlu0 %v1068_v23  ;;  %v1080_v23 = vmov 26  }
  0x82   :  { %607 = vperm.xlu0 %951, %v1147_v2  }
  0x84   :  { %388 = vrot.lane.b32.xlu1 %v1151_v3, %s1069_s29 }
  0x86   :  { %954 = vset.pattern.permute.xlu0 %v1070_v24 }
  0x87   :  { %676 = vperm.xlu0 %954, %v1147_v2  }
  0x88   :  { %390 = vrot.lane.b32.xlu1 %v1156_v5, %s1069_s29 }
  0x8b   :  { %957 = vset.pattern.permute.xlu0 %v1071_v25 }
  0x8c   :  { %745 = vperm.xlu0 %957, %v1147_v2   ;;  %418 = vrot.lane.b32.xlu1 %v1151_v3, %s1072_s30 }
  0x90   :  { %420 = vrot.lane.b32.xlu1 %v1156_v5, %s1072_s30  ;;  %960 = vset.pattern.permute.xlu0 %v1039_v4 }
  0x94   :  { %448 = vrot.lane.b32.xlu1 %v1151_v3, %s1073_s6 }
  0x98   :  { %450 = vrot.lane.b32.xlu1 %v1156_v5, %s1073_s6 }
  0x9c   :  { %478 = vrot.lane.b32.xlu1 %v1151_v3, %s1074_s7 }
  0xa0   :  { %480 = vrot.lane.b32.xlu1 %v1156_v5, %s1074_s7 }
  0xa4   :  { %508 = vrot.lane.b32.xlu1 %v1151_v3, %s1075_s8 }
  0xa7   :  { %v112_v27 = vpop.permute.xlu1 %111  ;;  %v53_v34 = vpop.permute.xlu0 %52 }
  0xa8   :  { %510 = vrot.lane.b32.xlu1 %v1156_v5, %s1075_s8  ;;  %v55_v47 = vmul.f32 %v53_v34, %v1151_v3  ;;  %v56_v48 = vmul.f32 %v53_v34, %v1156_v5 }
  0xab   :  { %v58_v30 = vpop.permute.xlu1 %57 }
  0xac   :  { %538 = vrot.lane.b32.xlu1 %v1151_v3, %s1076_s9  ;;  %v82_v44 = vpop.permute.xlu0 %81 }
  0xaf   :  { %v60_v37 = vpop.permute.xlu1 %59 }
  0xb0   :  { %v1219_v38 = vsel %vm63_vm0, %v58_v30, %v60_v37  ;;  %v1221_v39 = vsel %vm63_vm0, %v60_v37, %v58_v30  ;;  %540 = vrot.lane.b32.xlu1 %v1156_v5, %s1076_s9  ;;  %v486_v5 = vld [vmem:[#allocation5 + $0x17] ss:$8 sm:$0x3]  ;;  %vm542_vm0 = vcmp.lt.s32.totalorder %v1209_v29, 119 }
  0xb1   :  { %v78_v41 = vmul.f32 %v71_v35, %v1221_v39  ;;  %v79_v42 = vmul.f32 %v75_v36, %v1219_v38  ;;  %v142_v13 = vpop.permute.xlu0 %141 }
  0xb3   :  { %v89_v43 = vpop.permute.xlu1 %88  ;;  %v84_v49 = vmul.f32 %v82_v44, %v78_v41  ;;  %v85_v50 = vmul.f32 %v82_v44, %v79_v42  ;;  %v191_v41 = vrot.slane %v186_v33, %v1211_v31  ;;  %v195_v42 = vrot.slane %v186_v33, %v1213_v32 }
  0xb4   :  { %630 = vperm.xlu1 %952, %v1147_v2  }
  0xb5   :  { %v86_v58 = vadd.f32 %v84_v49, %v55_v47  ;;  %v87_v59 = vadd.f32 %v85_v50, %v56_v48  ;;  %v216_v49 = vld [vmem:[#allocation5 + $0x5] ss:$8 sm:$0x3] }
  0xb6   :  { %v172_v30 = vpop.permute.xlu0 %171  ;;  %v221_v57 = vrot.slane %v216_v49, %v1211_v31 }
  0xb7   :  { %v91_v51 = vpop.permute.xlu1 %90 }
  0xb8   :  { %v1232_v52 = vsel %vm92_vm1, %v89_v43, %v91_v51  ;;  %v1234_v53 = vsel %vm92_vm1, %v91_v51, %v89_v43  ;;  %953 = vset.pattern.permute.xlu1 %v1077_v54  ;;  %v776_v43 = vld [vmem:[%s1460_s4] sm:$0xff]  ;;  %vm782_vm1 = vcmask 64512  }
  0xb9   :  { %v108_v55 = vmul.f32 %v101_v45, %v1234_v53  ;;  %v109_v56 = vmul.f32 %v105_v46, %v1232_v52  ;;  %653 = vperm.xlu1 %953, %v1147_v2  }
  0xbb   :  { %v114_v60 = vmul.f32 %v112_v27, %v108_v55  ;;  %v115_v61 = vmul.f32 %v112_v27, %v109_v56  ;;  %v119_v62 = vpop.permute.xlu1 %118  ;;  %v202_v48 = vpop.permute.xlu0 %201 }
  0xbd   :  { %955 = vset.pattern.permute.xlu1 %v1078_v63  ;;  %v116_v6 = vadd.f32 %v114_v60, %v86_v58  ;;  %v117_v7 = vadd.f32 %v115_v61, %v87_v59  ;;  %v225_v58 = vrot.slane %v216_v49, %v1213_v32 }
  0xbe   :  { %699 = vperm.xlu1 %955, %v1147_v2  }
  0xbf   :  { %v121_v8 = vpop.permute.xlu1 %120 }
  0xc0   :  { %v1243_v9 = vsel %vm122_vm2, %v119_v62, %v121_v8  ;;  %v1245_v10 = vsel %vm122_vm2, %v121_v8, %v119_v62 }
  0xc1   :  { %v138_v11 = vmul.f32 %v131_v0, %v1245_v10  ;;  %v139_v12 = vmul.f32 %v135_v1, %v1243_v9  ;;  %v232_v0 = vpop.permute.xlu0 %231  ;;  %v246_v1 = vld [vmem:[#allocation5 + $0x6] ss:$8 sm:$0x3] }
  0xc2   :  { %956 = vset.pattern.permute.xlu1 %v1079_v14  ;;  %v255_v14 = vrot.slane %v246_v1, %v1213_v32 }
  0xc3   :  { %v144_v16 = vmul.f32 %v142_v13, %v138_v11  ;;  %v145_v17 = vmul.f32 %v142_v13, %v139_v12  ;;  %722 = vperm.xlu1 %956, %v1147_v2   ;;  %v149_v18 = vpop.permute.xlu1 %148  ;;  %v251_v13 = vrot.slane %v246_v1, %v1211_v31 }
  0xc5   :  { %v146_v19 = vadd.f32 %v144_v16, %v116_v6  ;;  %v147_v20 = vadd.f32 %v145_v17, %v117_v7 }
  0xc7   :  { %958 = vset.pattern.permute.xlu1 %v1080_v23  ;;  %v151_v24 = vpop.permute.xlu1 %150 }
  0xc8   :  { %v1253_v25 = vsel %vm152_vm3, %v149_v18, %v151_v24  ;;  %v1255_v26 = vsel %vm152_vm3, %v151_v24, %v149_v18  ;;  %768 = vperm.xlu1 %958, %v1147_v2   ;;  %v1081_v2 = vmov 0.0  }
  0xc9   :  { %v168_v27 = vmul.f32 %v161_v21, %v1255_v26  ;;  %v169_v28 = vmul.f32 %v165_v22, %v1253_v25  ;;  %850 = vmatprep.mubr.f32.mxu0 %v1081_v2 }
  0xcb   :  { %v174_v34 = vmul.f32 %v172_v30, %v168_v27  ;;  %v175_v35 = vmul.f32 %v172_v30, %v169_v28  ;;  %v179_v36 = vpop.permute.xlu1 %178 }
  0xcc   :  { %959 = vset.pattern.permute.xlu1 %v1039_v4 }
  0xcd   :  { %v176_v37 = vadd.f32 %v174_v34, %v146_v19  ;;  %v177_v40 = vadd.f32 %v175_v35, %v147_v20  ;;  %779 = vperm.xlu1 %959, %v776_v43   ;;  %v262_v20 = vpop.permute.xlu0 %261 }
  0xcf   :  { %v181_v44 = vpop.permute.xlu1 %180 }
  0xd0   :  { %v1267_v45 = vsel %vm182_vm4, %v179_v36, %v181_v44  ;;  %v1269_v46 = vsel %vm182_vm4, %v181_v44, %v179_v36 }
  0xd1   :  { %v198_v4 = vmul.f32 %v191_v41, %v1269_v46  ;;  %v199_v47 = vmul.f32 %v195_v42, %v1267_v45  ;;  %v292_v34 = vpop.permute.xlu0 %291 }
  0xd3   :  { %v204_v50 = vmul.f32 %v202_v48, %v198_v4  ;;  %v205_v51 = vmul.f32 %v202_v48, %v199_v47  ;;  %v209_v54 = vpop.permute.xlu1 %208 }
  0xd5   :  { %v206_v55 = vadd.f32 %v204_v50, %v176_v37  ;;  %v207_v56 = vadd.f32 %v205_v51, %v177_v40  ;;  %v322_v37 = vpop.permute.xlu0 %321  ;;  %v276_v50 = vld [vmem:[#allocation5 + $0x7] ss:$8 sm:$0x3] }
  0xd7   :  { %v211_v59 = vpop.permute.xlu1 %210 }
  0xd8   :  { %v1276_v60 = vsel %vm212_vm5, %v209_v54, %v211_v59  ;;  %v1278_v61 = vsel %vm212_vm5, %v211_v59, %v209_v54  ;;  %v281_v54 = vrot.slane %v276_v50, %v1211_v31 }
  0xd9   :  { %v228_v62 = vmul.f32 %v221_v57, %v1278_v61  ;;  %v229_v63 = vmul.f32 %v225_v58, %v1276_v60  ;;  %v1295_v41 = vpop.permute.xlu0 %351 }
  0xdb   :  { %v234_v6 = vmul.f32 %v232_v0, %v228_v62  ;;  %v235_v7 = vmul.f32 %v232_v0, %v229_v63  ;;  %v239_v8 = vpop.permute.xlu1 %238  ;;  %v336_v62 = vld [vmem:[#allocation5 + $0x11] ss:$8 sm:$0x3]  ;;  %v366_v63 = vld [vmem:[#allocation5 + $0x12] ss:$8 sm:$0x3] }
  0xdd   :  { %v236_v11 = vadd.f32 %v234_v6, %v206_v55  ;;  %v237_v12 = vadd.f32 %v235_v7, %v207_v56  ;;  %v1297_v43 = vpop.permute.xlu0 %381  ;;  %v285_v55 = vrot.slane %v276_v50, %v1213_v32  ;;  %v306_v56 = vld [vmem:[#allocation5 + $0x10] ss:$8 sm:$0x3]  ;;  %v456_v50 = vld [vmem:[#allocation5 + $0x16] ss:$8 sm:$0x3] }
  0xde   :  { %v311_v0 = vrot.slane %v306_v56, %v1211_v31  ;;  %v315_v1 = vrot.slane %v306_v56, %v1213_v32 }
  0xdf   :  { %v241_v15 = vpop.permute.xlu1 %240 }
  0xe0   :  { %v1285_v16 = vsel %vm242_vm6, %v239_v8, %v241_v15  ;;  %v1287_v17 = vsel %vm242_vm6, %v241_v15, %v239_v8  ;;  %v345_v15 = vrot.slane %v336_v62, %v1213_v32 }
  0xe1   :  { %v258_v18 = vmul.f32 %v251_v13, %v1287_v17  ;;  %v259_v19 = vmul.f32 %v255_v14, %v1285_v16  ;;  %v1299_v4 = vpop.permute.xlu0 %411  ;;  %v396_v13 = vld [vmem:[#allocation5 + $0x13] ss:$8 sm:$0x3]  ;;  %v341_v14 = vrot.slane %v336_v62, %v1211_v31 }
  0xe3   :  { %v264_v21 = vmul.f32 %v262_v20, %v258_v18  ;;  %v265_v22 = vmul.f32 %v262_v20, %v259_v19  ;;  %v269_v23 = vpop.permute.xlu1 %268  ;;  %v371_v18 = vrot.slane %v366_v63, %v1211_v31  ;;  %v426_v19 = vld [vmem:[#allocation5 + $0x14] ss:$8 sm:$0x3] }
  0xe5   :  { %v1291_v24 = vadd.f32 %v264_v21, %v236_v11  ;;  %v1293_v27 = vadd.f32 %v265_v22, %v237_v12  ;;  %v1305_v49 = vpop.permute.xlu0 %441  ;;  %v375_v22 = vrot.slane %v366_v63, %v1213_v32 }
  0xe7   :  { %v271_v28 = vpop.permute.xlu1 %270 }
  0xe8   :  { %v1312_v57 = vsel %vm272_vm7, %v269_v23, %v271_v28  ;;  %v1314_v58 = vsel %vm272_vm7, %v271_v28, %v269_v23 }
  0xe9   :  { %v1317_v59 = vpop.permute.xlu0 %471  ;;  %v288_v7 = vmul.f32 %v281_v54, %v1314_v58  ;;  %v289_v8 = vmul.f32 %v285_v55, %v1312_v57 }
  0xeb   :  { %v299_v30 = vpop.permute.xlu1 %298  ;;  %v294_v55 = vmul.f32 %v292_v34, %v288_v7  ;;  %v295_v56 = vmul.f32 %v292_v34, %v289_v8  ;;  %v461_v34 = vrot.slane %v456_v50, %v1211_v31  ;;  %v465_v7 = vrot.slane %v456_v50, %v1213_v32 }
  0xed   :  { %v1338_v62 = vpop.permute.xlu0 %501 }
  0xef   :  { %v301_v33 = vpop.permute.xlu1 %300 }
  0xf0   :  { %v1324_v11 = vsel %vm302_vm8, %v299_v30, %v301_v33  ;;  %v1326_v12 = vsel %vm302_vm8, %v301_v33, %v299_v30  ;;  %v401_v30 = vrot.slane %v396_v13, %v1211_v31  ;;  %v405_v33 = vrot.slane %v396_v13, %v1213_v32 }
  0xf1   :  { %1468 = vst [vmem:[#allocation13_spill] sm:$0xff] %v1324_v11  ;;  %1469 = vst [vmem:[#allocation14_spill] sm:$0xff] %v1326_v12  ;;  %v318_v23 = vmul.f32 %v311_v0, %v1326_v12  ;;  %v319_v28 = vmul.f32 %v315_v1, %v1324_v11  ;;  %v435_v13 = vrot.slane %v426_v19, %v1213_v32 }
  0xf2   :  { %v297_v12 = vadd.f32 %v295_v56, %v1293_v27  ;;  %v495_v27 = vrot.slane %v486_v5, %v1213_v32 }
  0xf3   :  { %v329_v35 = vpop.permute.xlu1 %328  ;;  %v324_v8 = vmul.f32 %v322_v37, %v318_v23  ;;  %v325_v3 = vmul.f32 %v322_v37, %v319_v28  ;;  %v532_v28 = vpop.permute.xlu0 %531 }
  0xf7   :  { %v331_v36 = vpop.permute.xlu1 %330 }
  0xf8   :  { %v333_v20 = vsel %vm332_vm9, %v329_v35, %v331_v36  ;;  %v334_v21 = vsel %vm332_vm9, %v331_v36, %v329_v35  ;;  %v431_v35 = vrot.slane %v426_v19, %v1211_v31  ;;  %v296_v19 = vadd.f32 %v294_v55, %v1291_v24 }
  0xf9   :  { %v348_v36 = vmul.f32 %v341_v14, %v334_v21  ;;  %v349_v63 = vmul.f32 %v345_v15, %v333_v20 }
  0xfa   :  { %v326_v24 = vadd.f32 %v324_v8, %v296_v19  ;;  %v569_v19 = vld [vmem:[#allocation5 + $0x22] ss:$8 sm:$0x3] }
  0xfb   :  { %v359_v40 = vpop.permute.xlu1 %358  ;;  %v354_v23 = vmul.f32 %v1295_v41, %v348_v36  ;;  %v355_v37 = vmul.f32 %v1295_v41, %v349_v63 }
  0xff   :  { %v361_v42 = vpop.permute.xlu1 %360 }
 0x100   :  { %v363_v0 = vsel %vm362_vm10, %v359_v40, %v361_v42  ;;  %v364_v1 = vsel %vm362_vm10, %v361_v42, %v359_v40  ;;  %v491_v42 = vrot.slane %v486_v5, %v1211_v31 }
 0x101   :  { %v378_v21 = vmul.f32 %v371_v18, %v364_v1  ;;  %v379_v40 = vmul.f32 %v375_v22, %v363_v0  ;;  %v327_v18 = vadd.f32 %v325_v3, %v297_v12 }
 0x103   :  { %v389_v2 = vpop.permute.xlu1 %388  ;;  %v384_v41 = vmul.f32 %v1297_v43, %v378_v21  ;;  %v357_v3 = vadd.f32 %v355_v37, %v327_v18 }
 0x107   :  { %v391_v44 = vpop.permute.xlu1 %390 }
 0x108   :  { %v393_v14 = vsel %vm392_vm11, %v389_v2, %v391_v44  ;;  %v394_v15 = vsel %vm392_vm11, %v391_v44, %v389_v2 }
 0x109   :  { %v408_v50 = vmul.f32 %v401_v30, %v394_v15  ;;  %v409_v11 = vmul.f32 %v405_v33, %v393_v14  ;;  %v385_v30 = vmul.f32 %v1297_v43, %v379_v40  ;;  %v562_v14 = vpop.permute.xlu0 %561 }
 0x10b   :  { %v1301_v47 = vpop.permute.xlu1 %418  ;;  %v414_v56 = vmul.f32 %v1299_v4, %v408_v50  ;;  %v415_v36 = vmul.f32 %v1299_v4, %v409_v11 }
 0x10f   :  { %v1303_v48 = vpop.permute.xlu1 %420 }
 0x110   :  { %v423_v2 = vsel %vm422_vm12, %v1301_v47, %v1303_v48  ;;  %v424_v44 = vsel %vm422_vm12, %v1303_v48, %v1301_v47  ;;  %v516_v47 = vld [vmem:[#allocation5 + $0x20] ss:$8 sm:$0x3]  ;;  %v356_v48 = vadd.f32 %v354_v23, %v326_v24 }
 0x111   :  { %v438_v12 = vmul.f32 %v431_v35, %v424_v44  ;;  %v439_v5 = vmul.f32 %v435_v13, %v423_v2  ;;  %v521_v8 = vrot.slane %v516_v47, %v1211_v31  ;;  %v387_v13 = vadd.f32 %v385_v30, %v357_v3 }
 0x112   :  { %v386_v35 = vadd.f32 %v384_v41, %v356_v48  ;;  %v574_v30 = vrot.slane %v569_v19, %v1211_v31 }
 0x113   :  { %v1308_v51 = vpop.permute.xlu1 %448  ;;  %v444_v11 = vmul.f32 %v1305_v49, %v438_v12  ;;  %v417_v40 = vadd.f32 %v415_v36, %v387_v13 }
 0x114   :  { %v416_v21 = vadd.f32 %v414_v56, %v386_v35 }
 0x117   :  { %v451_v6 = vpop.permute.xlu1 %450 }
 0x118   :  { %v453_v33 = vsel %vm452_vm13, %v1308_v51, %v451_v6  ;;  %v454_v55 = vsel %vm452_vm13, %v451_v6, %v1308_v51  ;;  %v525_v51 = vrot.slane %v516_v47, %v1213_v32 }
 0x119   :  { %v468_v0 = vmul.f32 %v461_v34, %v453_v33  ;;  %v469_v1 = vmul.f32 %v465_v7, %v454_v55  ;;  %v585_v33 = vpop.permute.xlu0 %584  ;;  %v615_v55 = vld [vmem:[#allocation5 + $0x24] ss:$8 sm:$0x3] }
 0x11a   :  { %v620_v35 = vrot.slane %v615_v55, %v1211_v31  ;;  %v624_v13 = vrot.slane %v615_v55, %v1213_v32 }
 0x11b   :  { %v479_v54 = vpop.permute.xlu1 %478  ;;  %v474_v23 = vmul.f32 %v1317_v59, %v468_v0  ;;  %v475_v37 = vmul.f32 %v1317_v59, %v469_v1  ;;  %v578_v59 = vrot.slane %v569_v19, %v1213_v32 }
 0x11f   :  { %v481_v20 = vpop.permute.xlu1 %480 }
 0x120   :  { %v483_v43 = vsel %vm482_vm14, %v479_v54, %v481_v20  ;;  %v484_v63 = vsel %vm482_vm14, %v481_v20, %v479_v54  ;;  %v445_v54 = vmul.f32 %v1305_v49, %v439_v5  ;;  %v546_v20 = vld [vmem:[#allocation5 + $0x21] ss:$8 sm:$0x3]  ;;  %v592_v49 = vld [vmem:[#allocation5 + $0x23] ss:$8 sm:$0x3] }
 0x121   :  { %v498_v34 = vmul.f32 %v491_v42, %v483_v43  ;;  %v499_v7 = vmul.f32 %v495_v27, %v484_v63  ;;  %v551_v24 = vrot.slane %v546_v20, %v1211_v31  ;;  %v555_v18 = vrot.slane %v546_v20, %v1213_v32  ;;  %v638_v63 = vld [vmem:[#allocation5 + $0x25] ss:$8 sm:$0x3] }
 0x122   :  { %v446_v42 = vadd.f32 %v444_v11, %v416_v21  ;;  %v447_v27 = vadd.f32 %v445_v54, %v417_v40  ;;  %v597_v56 = vrot.slane %v592_v49, %v1211_v31  ;;  %v601_v36 = vrot.slane %v592_v49, %v1213_v32  ;;  %v608_v40 = vpop.permute.xlu0 %607 }
 0x123   :  { %v509_v22 = vpop.permute.xlu1 %508  ;;  %v505_v41 = vmul.f32 %v1338_v62, %v499_v7  ;;  %v643_v21 = vrot.slane %v638_v63, %v1211_v31 }
 0x124   :  { %v476_v47 = vadd.f32 %v474_v23, %v446_v42  ;;  %v477_v48 = vadd.f32 %v475_v37, %v447_v27  ;;  %v604_v7 = vmul.f32 %v597_v56, %v1232_v52  ;;  %v605_v20 = vmul.f32 %v601_v36, %v1234_v53 }
 0x125   :  { %v650_v42 = vmul.f32 %v643_v21, %v1253_v25 }
 0x126   :  { %v507_v1 = vadd.f32 %v505_v41, %v477_v48  ;;  %v611_v53 = vmul.f32 %v608_v40, %v605_v20 }
 0x127   :  { %v511_v6 = vpop.permute.xlu1 %510 }
 0x128   :  { %v513_v15 = vsel %vm512_vm15, %v509_v22, %v511_v6  ;;  %v514_v4 = vsel %vm512_vm15, %v511_v6, %v509_v22  ;;  %v504_v22 = vmul.f32 %v1338_v62, %v498_v34  ;;  %v581_v6 = vmul.f32 %v574_v30, %v1219_v38 }
 0x129   :  { %v528_v50 = vmul.f32 %v521_v8, %v513_v15  ;;  %v529_v2 = vmul.f32 %v525_v51, %v514_v4  ;;  %v661_v15 = vld [vmem:[#allocation5 + $0x26] ss:$8 sm:$0x3]  ;;  %v647_v38 = vrot.slane %v638_v63, %v1213_v32  ;;  %v730_v63 = vld [vmem:[#allocation5 + $0x31] ss:$8 sm:$0x3] }
 0x12a   :  { %v506_v0 = vadd.f32 %v504_v22, %v476_v47  ;;  %v587_v19 = vmul.f32 %v585_v33, %v581_v6  ;;  %v670_v52 = vrot.slane %v661_v15, %v1213_v32 }
 0x12b   :  { %v539_v44 = vpop.permute.xlu1 %538  ;;  %v534_v3 = vmul.f32 %v532_v28, %v528_v50  ;;  %v535_v12 = vmul.f32 %v532_v28, %v529_v2  ;;  %v582_v28 = vmul.f32 %v578_v59, %v1221_v39  ;;  %v684_v39 = vld [vmem:[#allocation5 + $0x27] ss:$8 sm:$0x3]  ;;  %v627_v2 = vmul.f32 %v620_v35, %v1243_v9  ;;  %v707_v9 = vld [vmem:[#allocation5 + $0x30] ss:$8 sm:$0x3] }
 0x12c   :  { %v651_v27 = vmul.f32 %v647_v38, %v1255_v26  ;;  %v689_v22 = vrot.slane %v684_v39, %v1211_v31  ;;  %v693_v41 = vrot.slane %v684_v39, %v1213_v32  ;;  %v674_v48 = vmul.f32 %v670_v52, %v1269_v46 }
 0x12d   :  { %v536_v4 = vadd.f32 %v534_v3, %v506_v0  ;;  %v537_v11 = vadd.f32 %v535_v12, %v507_v1  ;;  %v588_v23 = vmul.f32 %v585_v33, %v582_v28  ;;  %v677_v3 = vpop.permute.xlu0 %676  ;;  %v753_v28 = vld [vmem:[#allocation5 + $0x32] ss:$8 sm:$0x3]  ;;  %v735_v35 = vrot.slane %v730_v63, %v1211_v31 }
 0x12e   :  { %v696_v26 = vmul.f32 %v689_v22, %v1276_v60  ;;  %v697_v36 = vmul.f32 %v693_v41, %v1278_v61  ;;  %v680_v1 = vmul.f32 %v677_v3, %v674_v48 }
 0x12f   :  { %v541_v5 = vpop.permute.xlu1 %540  ;;  %v742_v21 = vmul.f32 %v735_v35, %v1312_v57  ;;  %v775_v57 = vld [vmem:[%s1459_s3] sm:$0xff]  ;;  %s1005_s3 = scalar_lea.vmem %s872_s14, 256 }
 0x130   :  { %v543_v43 = vsel %vm542_vm0, %v539_v44, %v541_v5  ;;  %v544_v62 = vsel %vm542_vm0, %v541_v5, %v539_v44  ;;  %v628_v44 = vmul.f32 %v624_v13, %v1245_v10  ;;  %v739_v13 = vrot.slane %v730_v63, %v1213_v32  ;;  %p1006_p2 = scmp.ne.s32.totalorder %s872_s14, %s1005_s3  ;;  %p1011_p4 = scmp.lt.s32.totalorder %s1005_s3, %s1005_s3 }
 0x131   :  { %v558_v8 = vmul.f32 %v551_v24, %v543_v43  ;;  %v559_v51 = vmul.f32 %v555_v18, %v544_v62  ;;  %v610_v24 = vmul.f32 %v608_v40, %v604_v7  ;;  %v712_v43 = vrot.slane %v707_v9, %v1211_v31  ;;  %v746_v7 = vpop.permute.xlu0 %745 }
 0x132   :  { %v716_v62 = vrot.slane %v707_v9, %v1213_v32  ;;  %v743_v38 = vmul.f32 %v739_v13, %v1314_v58  ;;  %p1012_p5 = por %p1011_p4, %p1010_p3 }
 0x133   :  { %v564_v54 = vmul.f32 %v562_v14, %v558_v8  ;;  %v565_v34 = vmul.f32 %v562_v14, %v559_v51  ;;  %v631_v29 = vpop.permute.xlu1 %630  ;;  %v666_v14 = vrot.slane %v661_v15, %v1211_v31  ;;  %v719_v61 = vmul.f32 %v712_v43, %v1285_v16 }
 0x134   :  { %v633_v33 = vmul.f32 %v631_v29, %v627_v2  ;;  %v634_v55 = vmul.f32 %v631_v29, %v628_v44  ;;  %v762_v29 = vrot.slane %v753_v28, %v1213_v32  ;;  %v1471_v2 = vld [vmem:[#allocation14_spill] sm:$0xff]  ;;  %p1013_p6 = pnand %p1012_p5, %p1006_p2 }
 0x135   :  { %v566_v37 = vadd.f32 %v564_v54, %v536_v4  ;;  %v567_v50 = vadd.f32 %v565_v34, %v537_v11  ;;  %v673_v47 = vmul.f32 %v666_v14, %v1267_v45  ;;  %v720_v4 = vmul.f32 %v716_v62, %v1287_v17 }
 0x136   :  { %v758_v34 = vrot.slane %v753_v28, %v1211_v31  ;;  %v766_v44 = vmul.f32 %v762_v29, %v1471_v2 }
 0x137   :  { %v590_v18 = vadd.f32 %v588_v23, %v567_v50  ;;  %v589_v49 = vadd.f32 %v587_v19, %v566_v37  ;;  %v679_v0 = vmul.f32 %v677_v3, %v673_v47  ;;  %v748_v19 = vmul.f32 %v746_v7, %v742_v21  ;;  %v1470_v50 = vld [vmem:[#allocation13_spill] sm:$0xff] }
 0x138   :  { %v654_v30 = vpop.permute.xlu1 %653  ;;  %v749_v23 = vmul.f32 %v746_v7, %v743_v38  ;;  %v765_v17 = vmul.f32 %v758_v34, %v1470_v50 }
 0x139   :  { %v613_v59 = vadd.f32 %v611_v53, %v590_v18  ;;  %v612_v10 = vadd.f32 %v610_v24, %v589_v49  ;;  %v656_v25 = vmul.f32 %v654_v30, %v650_v42  ;;  %v657_v56 = vmul.f32 %v654_v30, %v651_v27 }
 0x13b   :  { %v635_v12 = vadd.f32 %v633_v33, %v612_v10  ;;  %v636_v5 = vadd.f32 %v634_v55, %v613_v59  ;;  %v1472_v10 = vld [vmem:[#allocation11_spill] sm:$0xff]  ;;  %v1473_v55 = vld [vmem:[#allocation12_spill] sm:$0xff] }
 0x13d   :  { %v658_v8 = vadd.f32 %v656_v25, %v635_v12  ;;  %v659_v45 = vadd.f32 %v657_v56, %v636_v5  ;;  %v700_v51 = vpop.permute.xlu1 %699 }
 0x13e   :  { %v702_v46 = vmul.f32 %v700_v51, %v696_v26  ;;  %v703_v6 = vmul.f32 %v700_v51, %v697_v36 }
 0x13f   :  { %v682_v60 = vadd.f32 %v680_v1, %v659_v45  ;;  %v681_v15 = vadd.f32 %v679_v0, %v658_v8 }
 0x141   :  { %v704_v11 = vadd.f32 %v702_v46, %v681_v15  ;;  %v705_v54 = vadd.f32 %v703_v6, %v682_v60 }
 0x142   :  { %v723_v20 = vpop.permute.xlu1 %722 }
 0x143   :  { %v725_v40 = vmul.f32 %v723_v20, %v719_v61  ;;  %v726_v39 = vmul.f32 %v723_v20, %v720_v4 }
 0x145   :  { %v727_v37 = vadd.f32 %v725_v40, %v704_v11  ;;  %v728_v16 = vadd.f32 %v726_v39, %v705_v54 }
 0x147   :  { %v769_v14 = vpop.permute.xlu1 %768  ;;  %v751_v31 = vadd.f32 %v749_v23, %v728_v16  ;;  %v750_v52 = vadd.f32 %v748_v19, %v727_v37 }
 0x148   :  { %v771_v32 = vmul.f32 %v769_v14, %v765_v17  ;;  %v772_v24 = vmul.f32 %v769_v14, %v766_v44 }
 0x14a   :  { %v774_v53 = vadd.f32 %v772_v24, %v751_v31  ;;  %v773_v18 = vadd.f32 %v771_v32, %v750_v52 }
 0x14c   :  { %786 = vmatprep.subr.mxu0 %v774_v53  ;;  %v780_v58 = vpop.permute.xlu1 %779 }
 0x14d   :  { %787 = vmatpush1.msra.mxu0 %v773_v18 }
 0x14e   :  { %881 = vmatmul.mubr.msk.f32.vlgmr.msra.gmra.mrb[0].mxu0 %vm782_vm1, %v775_v57 }
 0x221   :  { %v852_v49 = vpop.f32.mrb[0].mxu0 }
 0x222   :  { %v853_v42 = vadd.f32 %v852_v49, %v780_v58  ;;  %v854_v27 = vpop.f32.mrb[1].mxu0 }
 0x223   :  { %v855_v22 = vadd.f32 %v854_v27, %v780_v58 }
 0x224   :  { %v857_v41 = vmax.f32 %v853_v42, 0.0 }
 0x225   :  { %v858_v30 = vmax.f32 %v855_v22, 0.0 }
 0x226   :  { %v859_v9 = vmin.f32 %v857_v41, 6.0 }
 0x227   :  { %v860_v59 = vmin.f32 %v858_v30, 6.0 }
 0x228   :  { %v861_v33 = vadd.f32 %v859_v9, %v1472_v10 }
 0x229   :  { %v862_v47 = vadd.f32 %v860_v59, %v1473_v55 }
 0x22a   :  { %863 = vst [vmem:[#allocation7] sm:$0xff] %v861_v33 }
 0x22b   :  { %864 = vst [vmem:[#allocation7 + $0x8] sm:$0xff] %v862_v47 }
 0x22c   :  { %1016 = shalt.err (!%p1013_p6)
}
 0x22d   :  { %s1017_s16 = scalar_lea.hbm %s1461_s5, 256 }
 0x22e   :  { %p1018_p7 = scmp.ne.s32.totalorder %s1461_s5, %s1017_s16  ;;  %p1021_p8 = scmp.lt.u32.totalorder %s1017_s16, %s1461_s5 }
 0x230   :  { %p1023_p9 = pnand %p1021_p8, %p1018_p7 }
 0x232   :  { %1026 = shalt.err (!%p1023_p9)
}
 0x233   :  { %874 = dma.vmem_to_hbm [thread:$0]  %s872_s14, 256, %s1461_s5, [#allocation4]  }
 0x234   :  { %1031 = dma.done.wait [#allocation4], 256  }
 0x235   :  { %1032 = vsyncadd [#allocation4], 4294967040 }
 0x236   :  { %878 = vsyncpa [#allocation3], 1 }
 0x237   :  { %879 = vsyncpa [#allocation6], 1 }
 0x238   :  { %880 = vsyncpa [#allocation4], 1 }

</bundles_post_ra>
